<compile_context>
chip_gen: v6e
topology: v6e:2x2x1
jax: 0.10.0
libtpu: 0.0.40
codegen_flags: <defaults>
</compile_context>

<pallas_src>
import functools

import jax
import jax.numpy as jnp
from jax.experimental import pallas as pl
from jax.experimental.pallas import tpu as pltpu


# ---------------------------------------------------------------------------
# Kernels
# ---------------------------------------------------------------------------
def _dma_copy_kernel(w_hbm_ref, o_hbm_ref, sem):
    """Same-dtype path: one HBM->HBM DMA; no VMEM staging, no TC work."""
    cp = pltpu.make_async_copy(w_hbm_ref, o_hbm_ref, sem)
    cp.start()
    cp.wait()


def _dma_copy_kernel_aliased(x_hbm_ref, w_hbm_ref, o_hbm_ref, sem):
    # `x_hbm_ref` is the donated destination buffer (aliased onto the output
    # via input_output_aliases); its contents are never read (x.copy_).
    del x_hbm_ref
    _dma_copy_kernel(w_hbm_ref, o_hbm_ref, sem)


def _cast_copy_kernel(w_ref, o_ref):
    """Dtype-cast path: VMEM tile load -> cast -> lane-dense store."""
    o_ref[...] = w_ref[...].astype(o_ref.dtype)


def _cast_copy_kernel_aliased(x_hbm_ref, w_ref, o_ref):
    del x_hbm_ref
    _cast_copy_kernel(w_ref, o_ref)


# ---------------------------------------------------------------------------
# Helpers
# ---------------------------------------------------------------------------
def _ceil_div(a, b):
    return -(-a // b)


def _pick_lane_width(n_elems, cap=16384):
    """Largest multiple of 128 that divides n_elems, capped at `cap` (so big
    tables keep several row-tiles and can shard across v7x's 2 TCs).
    Returns None if 128 does not divide n_elems."""
    if n_elems % 128 != 0:
        return None
    m = n_elems // 128
    for k in range(min(m, cap // 128), 0, -1):
        if m % k == 0:
            return 128 * k
    return 128


# ---------------------------------------------------------------------------
# Wrapper (forward-pass equivalent of PretrainedEmbeddingsInitializer)
# ---------------------------------------------------------------------------
def pretrained_embeddings_initializer(
    x,
    weight_matrix,
    *,
    trainable=False,
    donate_x=False,
    small_table_bytes=1 << 20,
    vmem_budget_bytes=32 << 20,
):
    """Pallas equivalent of PretrainedEmbeddingsInitializer.forward.

    Returns `weight_matrix` cast to x.dtype (the contents of `x` are never
    read, matching x.copy_(weight_matrix)).  When trainable=False the result
    is wrapped in stop_gradient.

    donate_x=True requests true in-place semantics: x is passed into the
    kernel and aliased onto the output (input_output_aliases).  Only use it
    when the caller actually donates x (jit(..., donate_argnums=...)),
    otherwise XLA inserts a defensive copy of x and the alias is a net loss.
    """
    if x.ndim != 2 or x.shape != weight_matrix.shape:
        raise ValueError("x must be 2D and match weight_matrix shape")
    card, dim = x.shape
    n = card * dim
    out_dtype = x.dtype
    w_dtype = weight_matrix.dtype
    out_isize = jnp.dtype(out_dtype).itemsize
    w_isize = jnp.dtype(w_dtype).itemsize
    same_dtype = jnp.dtype(out_dtype) == jnp.dtype(w_dtype)

    def finish(out):
        if not trainable:
            # TODO(synk): torch's requires_grad flag has no direct Pallas
            # analog; modeled via stop_gradient on the returned table.
            out = jax.lax.stop_gradient(out)
        return out

    # ---- tiny-table fast path: pallas launch overhead dwarfs the copy -----
    if n * max(out_isize, w_isize) <= small_table_bytes:
        return finish(weight_matrix.astype(out_dtype))

    cost = pl.CostEstimate(
        flops=0, transcendentals=0, bytes_accessed=n * (out_isize + w_isize))

    # ---- same-dtype path: single HBM->HBM DMA (no VMEM round trip) --------
    if same_dtype:
        if donate_x:
            out = pl.pallas_call(
                _dma_copy_kernel_aliased,
                out_shape=jax.ShapeDtypeStruct((card, dim), out_dtype),
                in_specs=[pl.BlockSpec(memory_space=pl.ANY),
                          pl.BlockSpec(memory_space=pl.ANY)],
                out_specs=pl.BlockSpec(memory_space=pl.ANY),
                scratch_shapes=[pltpu.SemaphoreType.DMA(())],
                cost_estimate=cost,
                input_output_aliases={0: 0},
            )(x, weight_matrix)
        else:
            out = pl.pallas_call(
                _dma_copy_kernel,
                out_shape=jax.ShapeDtypeStruct((card, dim), out_dtype),
                in_specs=[pl.BlockSpec(memory_space=pl.ANY)],
                out_specs=pl.BlockSpec(memory_space=pl.ANY),
                scratch_shapes=[pltpu.SemaphoreType.DMA(())],
                cost_estimate=cost,
            )(weight_matrix)
        return finish(out)

    # ---- dtype-cast path: tiled, lane-dense VMEM copy ----------------------
    lane_w = _pick_lane_width(n)
    pad = 0
    if lane_w is None:
        # Ragged element count: flatten, zero-pad to a multiple of 128 so all
        # stores stay lane-dense (unmasked vst), slice the tail off afterwards.
        pad = _ceil_div(n, 128) * 128 - n
        w_flat = jnp.pad(weight_matrix.reshape(-1), (0, pad))
        lane_w = _pick_lane_width(n + pad)
        rows = (n + pad) // lane_w
        w2 = w_flat.reshape(rows, lane_w)
        x2 = None  # padded shape no longer matches x -> cannot alias
    else:
        rows = n // lane_w
        w2 = weight_matrix.reshape(rows, lane_w)
        x2 = x.reshape(rows, lane_w) if donate_x else None

    # Sublane alignment: 8 rows for 32-bit, 16 for 16-bit, 32 for 8-bit.
    min_isize = min(out_isize, w_isize)
    sub_align = 8 * max(1, 4 // max(1, min_isize))

    # True per-step VMEM footprint: double-buffered weight tile + output tile.
    per_row_bytes = 2 * (w_isize + out_isize) * lane_w
    rows_per_tile = max(1, vmem_budget_bytes // per_row_bytes)
    if rows_per_tile < rows:
        rows_per_tile = max(sub_align, (rows_per_tile // sub_align) * sub_align)
    rows_per_tile = min(rows_per_tile, rows)

    # v7x: for large tables keep >=4 grid steps (2 per TensorCore) so the
    # "parallel" grid axis can actually shard across both cores.
    if rows * lane_w * out_isize >= (4 << 20) and rows >= 4 * sub_align:
        if _ceil_div(rows, rows_per_tile) < 4:
            cand = max(sub_align,
                       (_ceil_div(rows, 4) // sub_align) * sub_align)
            rows_per_tile = min(rows_per_tile, cand)

    grid = (_ceil_div(rows, rows_per_tile),)

    # NOTE: when rows_per_tile does not divide rows, the last block reads past
    # `rows` (padding garbage) and Pallas masks the out-of-bounds part of the
    # store, so the (possibly aliased) live HBM output is never corrupted.
    w_spec = pl.BlockSpec((rows_per_tile, lane_w), lambda i: (i, 0))
    o_spec = pl.BlockSpec((rows_per_tile, lane_w), lambda i: (i, 0))
    common = dict(
        out_shape=jax.ShapeDtypeStruct((rows, lane_w), out_dtype),
        compiler_params=pltpu.CompilerParams(
            dimension_semantics=("parallel",),
            vmem_limit_bytes=48 * 1024 * 1024,
        ),
        cost_estimate=cost,
    )

    if x2 is not None:
        out2 = pl.pallas_call(
            _cast_copy_kernel_aliased,
            grid_spec=pltpu.PrefetchScalarGridSpec(
                num_scalar_prefetch=0, grid=grid,
                in_specs=[pl.BlockSpec(memory_space=pl.ANY), w_spec],
                out_specs=o_spec),
            input_output_aliases={0: 0},
            **common,
        )(x2, w2)
    else:
        out2 = pl.pallas_call(
            _cast_copy_kernel,
            grid_spec=pltpu.PrefetchScalarGridSpec(
                num_scalar_prefetch=0, grid=grid,
                in_specs=[w_spec], out_specs=o_spec),
            **common,
        )(w2)

    out_flat = out2.reshape(-1)
    if pad:
        out_flat = out_flat[:n]
    return finish(out_flat.reshape(card, dim))


# ---------------------------------------------------------------------------
# Demo / self-test
# ---------------------------------------------------------------------------
if __name__ == "__main__":
    key = jax.random.PRNGKey(0)
    k0, k1, k2, k3, k4 = jax.random.split(key, 5)

    # Case 1: same dtype, donated x -> aliased HBM->HBM DMA path.
    #   embedding_cardinality=64 (row 0 reserved for padding id=0), dim=128.
    card, dim = 64, 128
    w1 = jax.random.normal(k0, (card, dim), dtype=jnp.float32).at[0].set(0.0)
    x1 = jax.random.normal(k1, (card, dim), dtype=jnp.float32)
    fn1 = jax.jit(
        functools.partial(pretrained_embeddings_initializer,
                          trainable=False, donate_x=True, small_table_bytes=0),
        donate_argnums=(0,))
    r1 = jax.block_until_ready(fn1(x1, w1))
    assert r1.shape == (card, dim) and r1.dtype == jnp.float32
    assert bool(jnp.allclose(r1, w1)), "same-dtype aliased copy mismatch"

    # Case 2: same dtype, no donation -> plain HBM->HBM DMA path.
    w2 = jax.random.normal(k2, (32, 256), dtype=jnp.float32)
    x2 = jnp.zeros((32, 256), dtype=jnp.float32)
    r2 = jax.block_until_ready(
        jax.jit(functools.partial(pretrained_embeddings_initializer,
                                  small_table_bytes=0))(x2, w2))
    assert bool(jnp.allclose(r2, w2)), "same-dtype copy mismatch"

    # Case 3: dtype cast (f32 -> bf16), donated x -> aliased tiled VMEM path.
    w3 = jax.random.normal(k3, (128, 256), dtype=jnp.float32)
    x3 = jnp.zeros((128, 256), dtype=jnp.bfloat16)
    fn3 = jax.jit(
        functools.partial(pretrained_embeddings_initializer,
                          donate_x=True, small_table_bytes=0),
        donate_argnums=(0,))
    r3 = jax.block_until_ready(fn3(x3, w3))
    assert r3.shape == (128, 256) and r3.dtype == jnp.bfloat16
    assert bool(jnp.allclose(r3.astype(jnp.float32),
                             w3.astype(jnp.bfloat16).astype(jnp.float32))), \
        "cast-copy (aliased) mismatch"

    # Case 4: ragged, non-128-multiple element count with cast -> padded path.
    w4 = jax.random.normal(k4, (10, 48), dtype=jnp.float32)
    x4 = jnp.zeros((10, 48), dtype=jnp.bfloat16)
    r4 = jax.block_until_ready(
        jax.jit(functools.partial(pretrained_embeddings_initializer,
                                  small_table_bytes=0))(x4, w4))
    assert r4.shape == (10, 48) and r4.dtype == jnp.bfloat16
    assert bool(jnp.allclose(r4.astype(jnp.float32),
                             w4.astype(jnp.bfloat16).astype(jnp.float32))), \
        "ragged cast-copy mismatch"

    # Case 5: tiny-table fast path (default threshold, bypasses pallas_call).
    w5 = jax.random.normal(k0, (card, dim), dtype=jnp.float32)
    x5 = jnp.zeros((card, dim), dtype=jnp.float32)
    r5 = jax.block_until_ready(
        jax.jit(pretrained_embeddings_initializer)(x5, w5))
    assert bool(jnp.allclose(r5, w5)), "fast-path copy mismatch"

    print("KERNEL_OK")
</pallas_src>

<mosaic_0001>
module attributes {stable_mosaic.version = 11 : i64} {
  func.func @_dma_copy_kernel_aliased(%arg0: memref<64x128xf32, #tpu.memory_space<any>>, %arg1: memref<64x128xf32, #tpu.memory_space<any>>, %arg2: memref<64x128xf32, #tpu.memory_space<any>>, %arg3: memref<!tpu.dma_semaphore, #tpu.memory_space<semaphore_mem>>) attributes {dimension_semantics = [], scalar_prefetch = 0 : i64, scratch_operands = 1 : i64, tpu.core_type = #tpu.core_type<tc>} {
    tpu.enqueue_dma source(%arg1 : memref<64x128xf32, #tpu.memory_space<any>>) target(%arg2 : memref<64x128xf32, #tpu.memory_space<any>>) target_semaphore(%arg3 : memref<!tpu.dma_semaphore, #tpu.memory_space<semaphore_mem>>)
    tpu.wait_dma2 semaphore(%arg3 : memref<!tpu.dma_semaphore, #tpu.memory_space<semaphore_mem>>) src(%arg1 : memref<64x128xf32, #tpu.memory_space<any>>) dst(%arg2 : memref<64x128xf32, #tpu.memory_space<any>>)
    return
  }
}

</mosaic_0001>

<bundles_post_ra>
// kernel: pretrained_embeddings_initializer.1
= control target key start
LH: loop header
LB: loop body
LE: loop exit
PB: predicated region body
PF: predicated region fallthrough
CT: control target
= control target key end

     0   :  { %s29_s9 = smov [#allocation2]   ;;  %s30_s10 = smov 131072   ;;  %s53_s0 = inlined_call_operand.hbm [shape: f32[64,128], index: 0, kind: input, shape index: {}, may-alias: {0,2}]   ;;  %s54_s1 = inlined_call_operand.hbm [shape: f32[64,128], index: 1, kind: input, shape index: {}]   ;;  %s55_s2 = inlined_call_operand.hbm [shape: f32[64,128], index: 2, kind: output, shape index: {}, may-alias: {0,2}]  }
   0x1   :  { %s31_s11 = smov 0  }
   0x2   :  { %13 = dma.general %s54_s1, 1024, %s55_s2, %s29_s9, %s30_s10, [#allocation4], %s31_s11, 0  }
   0x3   :  { %27 = dma.done.wait [#allocation2], 1024 }
   0x4   :  { %28 = vsyncadd [#allocation2], 4294966272 }
   0x5   :  { %17 = vsyncmov [#allocation2] }
   0x8   :  { %s18_s0 = vpop.sfrf %17 }
   0x9   :  { %p23_p0 = scmp.ne.s32.totalorder %s18_s0, 0 }
   0xb   :  { %22 = shalt.err (%p23_p0)  }

</bundles_post_ra>
